<compile_context>
chip_gen: v7x
topology: tpu7x:2x2x1
jax: 0.10.0
libtpu: 0.0.40
codegen_flags: <defaults>
</compile_context>

<pallas_src>
import functools

import jax
import jax.numpy as jnp
from jax import lax
from jax.experimental import pallas as pl
from jax.experimental.pallas import tpu as pltpu


def _ema_kernel(x_ref, w_ref, o_ref, xt_ref, s_ref, *, t_blk):
    # x_ref : (C, t_blk)   input tile, native (B, C, T) layout (batch squeezed)
    # w_ref : (1, C)       pre-clamped smoothing coefficients
    # o_ref : (t_blk, C)   output tile, time-major (matches (B, T, C) output)
    # xt_ref: (t_blk, C)   VMEM scratch -- transposed staging of the input tile
    # s_ref : (1, C)       VMEM scratch -- EMA state carried across time tiles
    tb = pl.program_id(1)

    w = w_ref[...]            # (1, C)
    omw = 1.0 - w             # (1, C)

    # In-kernel tile transpose (XLU slot, idle here): (C, t_blk) -> (t_blk, C).
    # Replaces a wrapper-level HBM transpose, halving end-to-end HBM traffic.
    xt_ref[...] = jnp.transpose(x_ref[...], (1, 0))

    @pl.when(tb == 0)
    def _seed():
        # EMA state is seeded with the first frame of the sequence; the generic
        # update then reproduces s[0] (made bit-exact below).
        s_ref[...] = xt_ref[pl.ds(0, 1), :]

    n_slabs = t_blk // 8
    rem = t_blk - n_slabs * 8

    def slab_body(si, s):
        base = pl.multiple_of(si * 8, 8)
        xs = xt_ref[pl.ds(base, 8), :]                 # (8, C) full-sublane load
        rows = []
        for k in range(8):                             # static 8-step unroll
            s = w * xs[k:k + 1, :] + omw * s
            rows.append(s)
        o_ref[pl.ds(base, 8), :] = jnp.concatenate(rows, axis=0)  # one slab store
        return s

    s = lax.fori_loop(0, n_slabs, slab_body, s_ref[...])

    if rem:  # static tail when t_blk is not a multiple of 8
        base0 = n_slabs * 8

        def tail_body(k, s):
            x_t = xt_ref[pl.ds(base0 + k, 1), :]
            s = w * x_t + omw * s
            o_ref[pl.ds(base0 + k, 1), :] = s
            return s

        s = lax.fori_loop(0, rem, tail_body, s)

    s_ref[...] = s  # carry EMA state to the next time tile of this batch

    @pl.when(tb == 0)
    def _exact_first_frame():
        # The PyTorch scan emits x[..., 0] itself as the first output frame.
        o_ref[pl.ds(0, 1), :] = xt_ref[pl.ds(0, 1), :]


def _choose_time_block(T, C, budget_bytes=4 * 1024 * 1024):
    """Whole-T tile if it fits the VMEM budget; otherwise the largest multiple of
    128 that divides T (input tiles put time on the lane axis)."""
    per_frame = 5 * C * 4  # double-buffered in/out tiles + transposed scratch, f32
    if T * per_frame <= budget_bytes:
        return T
    best = None
    t_blk = 128
    while t_blk <= T:
        if T % t_blk == 0 and t_blk * per_frame <= budget_bytes:
            best = t_blk
        t_blk += 128
    return best if best is not None else T


def exponential_moving_average(x, weights, initial_state=None, *, t_blk=None):
    """Pallas TPU forward of ExponentialMovingAverage.

    x: (B, C, T) float32; weights: (C,) per-channel or (1,) scalar coeff.
    Returns (B, T, C) float32 (same layout as the PyTorch module).
    `initial_state` is accepted for API parity but ignored (the PyTorch forward
    seeds the EMA with the first frame).
    """
    del initial_state
    B, C, T = x.shape
    x = x.astype(jnp.float32)

    # Hoisted parameter prep: clamp + broadcast to (1, C) once, outside the kernel.
    w = jnp.clip(weights.astype(jnp.float32).reshape(1, -1), 0.0, 0.2)
    w = jnp.broadcast_to(w, (1, C))

    if t_blk is None:
        t_blk = _choose_time_block(T, C)
    nt = T // t_blk

    kernel = functools.partial(_ema_kernel, t_blk=t_blk)

    out = pl.pallas_call(
        kernel,
        out_shape=jax.ShapeDtypeStruct((B, T, C), jnp.float32),
        grid=(B, nt),
        in_specs=[
            # Native (B, C, T) layout; the kernel transposes the tile on-chip.
            pl.BlockSpec((pl.Squeezed(), C, t_blk), lambda b, t: (b, 0, t)),
            pl.BlockSpec((1, C), lambda b, t: (0, 0)),
        ],
        out_specs=pl.BlockSpec((pl.Squeezed(), t_blk, C), lambda b, t: (b, t, 0)),
        scratch_shapes=[
            pltpu.VMEM((t_blk, C), jnp.float32),  # time-major staging of the tile
            pltpu.VMEM((1, C), jnp.float32),      # EMA carry across time tiles
        ],
        compiler_params=pltpu.CompilerParams(
            dimension_semantics=("parallel", "arbitrary")),
    )(x, w)
    return out


def ema_reference(x, weights):
    """Pure-JAX mirror of the PyTorch forward."""
    w = jnp.clip(weights.astype(jnp.float32), 0.0, 0.2)
    xt = jnp.transpose(x, (2, 0, 1))                  # (T, B, C)

    def step(s, xi):
        s_new = w * xi + (1.0 - w) * s
        return s_new, s_new

    s0 = xt[0]
    _, rest = lax.scan(step, s0, xt[1:])
    res = jnp.concatenate([s0[None], rest], axis=0)   # (T, B, C)
    return jnp.transpose(res, (1, 0, 2))              # (B, T, C)


if __name__ == "__main__":
    # Small shapes consistent with the module: batch=2, channels=16, time=32.
    B, C, T = 2, 16, 32

    # Module config: per_channel=True, coeff_init=0.04 (inside the [0, 0.2] clamp).
    weights = jnp.full((C,), 0.04, dtype=jnp.float32)

    key = jax.random.PRNGKey(0)
    x = jnp.abs(jax.random.normal(key, (B, C, T), dtype=jnp.float32))
    initial_state = x[:, :, 0]   # accepted-but-unused, as in the PyTorch module

    out = exponential_moving_average(x, weights, initial_state)
    out = jax.block_until_ready(out)

    ref = ema_reference(x, weights)
    assert out.shape == (B, T, C), out.shape
    max_err = float(jnp.max(jnp.abs(out - ref)))
    assert jnp.allclose(out, ref, atol=1e-5, rtol=1e-5), max_err

    print("KERNEL_OK")
</pallas_src>

<mosaic_0001>
module attributes {stable_mosaic.version = 11 : i64} {
  func.func @_ema_kernel(%arg0: i32, %arg1: i32, %arg2: memref<1x16x32xf32, #tpu.memory_space<vmem>>, %arg3: memref<1x16xf32, #tpu.memory_space<vmem>>, %arg4: memref<1x32x16xf32, #tpu.memory_space<vmem>>, %arg5: memref<32x16xf32, #tpu.memory_space<vmem>>, %arg6: memref<1x16xf32, #tpu.memory_space<vmem>>) attributes {dimension_semantics = [#tpu.dimension_semantics<parallel>, #tpu.dimension_semantics<arbitrary>], iteration_bounds = array<i64: 2, 1>, scalar_prefetch = 0 : i64, scratch_operands = 2 : i64, tpu.core_type = #tpu.core_type<tc>, window_params = [{transform_indices = @transform_0, window_bounds = array<i64: 1, 16, 32>}, {pipeline_mode = #tpu.pipeline_mode<synchronous>, transform_indices = @transform_1, window_bounds = array<i64: 1, 16>}, {transform_indices = @transform_2, window_bounds = array<i64: 1, 32, 16>}]} {
    %c0 = arith.constant 0 : index
    %c0_0 = arith.constant 0 : index
    %0 = vector.load %arg3[%c0, %c0_0] : memref<1x16xf32, #tpu.memory_space<vmem>>, vector<1x16xf32>
    %cst = arith.constant 1.000000e+00 : f32
    %1 = vector.broadcast %cst : f32 to vector<1x16xf32>
    %2 = arith.subf %1, %0 : vector<1x16xf32>
    %c0_1 = arith.constant 0 : index
    %c0_2 = arith.constant 0 : index
    %c0_3 = arith.constant 0 : index
    %3 = vector.load %arg2[%c0_1, %c0_2, %c0_3] : memref<1x16x32xf32, #tpu.memory_space<vmem>>, vector<1x16x32xf32>
    %4 = vector.shape_cast %3 : vector<1x16x32xf32> to vector<16x32xf32>
    %5 = tpu.transpose %4, [1, 0] : vector<16x32xf32> -> vector<32x16xf32>
    %c0_4 = arith.constant 0 : index
    %c0_5 = arith.constant 0 : index
    %6 = vector.load %arg5[%c0_4, %c0_5] : memref<32x16xf32, #tpu.memory_space<vmem>>, vector<32x16xf32>
    tpu.vector_store %arg5[%c0_4, %c0_5], %5 {strides = array<i32>} : memref<32x16xf32, #tpu.memory_space<vmem>>, vector<32x16xf32>,
    %c0_i32 = arith.constant 0 : i32
    %7 = arith.cmpi eq, %arg1, %c0_i32 : i32
    %8 = arith.extui %7 : i1 to i32
    %c0_i32_6 = arith.constant 0 : i32
    %9 = arith.cmpi ne, %8, %c0_i32_6 : i32
    scf.if %9 {
      %c0_15 = arith.constant 0 : index
      %c0_16 = arith.constant 0 : index
      %17 = vector.load %arg5[%c0_15, %c0_16] : memref<32x16xf32, #tpu.memory_space<vmem>>, vector<1x16xf32>
      %c0_17 = arith.constant 0 : index
      %c0_18 = arith.constant 0 : index
      %18 = vector.load %arg6[%c0_17, %c0_18] : memref<1x16xf32, #tpu.memory_space<vmem>>, vector<1x16xf32>
      tpu.vector_store %arg6[%c0_17, %c0_18], %17 {strides = array<i32>} : memref<1x16xf32, #tpu.memory_space<vmem>>, vector<1x16xf32>,
    } else {
    }
    %c0_7 = arith.constant 0 : index
    %c0_8 = arith.constant 0 : index
    %10 = vector.load %arg6[%c0_7, %c0_8] : memref<1x16xf32, #tpu.memory_space<vmem>>, vector<1x16xf32>
    %c0_i32_9 = arith.constant 0 : i32
    %c4_i32 = arith.constant 4 : i32
    %11 = arith.addi %c0_i32_9, %c4_i32 : i32
    %c1_i32 = arith.constant 1 : i32
    %12 = scf.for %arg7 = %c0_i32_9 to %11 step %c1_i32 iter_args(%arg8 = %10) -> (vector<1x16xf32>)  : i32 {
      %c8_i32 = arith.constant 8 : i32
      %17 = arith.muli %arg7, %c8_i32 : i32
      %18 = tpu.assume_multiple %17, 8 : i32
      %19 = arith.index_cast %18 : i32 to index
      %c0_15 = arith.constant 0 : index
      %20 = vector.load %arg5[%19, %c0_15] : memref<32x16xf32, #tpu.memory_space<vmem>>, vector<8x16xf32>
      %21 = vector.extract_strided_slice %20 {offsets = [0, 0], sizes = [1, 16], strides = [1, 1]} : vector<8x16xf32> to vector<1x16xf32>
      %22 = arith.mulf %0, %21 : vector<1x16xf32>
      %23 = arith.mulf %2, %arg8 : vector<1x16xf32>
      %24 = arith.addf %22, %23 : vector<1x16xf32>
      %25 = vector.extract_strided_slice %20 {offsets = [1, 0], sizes = [1, 16], strides = [1, 1]} : vector<8x16xf32> to vector<1x16xf32>
      %26 = arith.mulf %0, %25 : vector<1x16xf32>
      %27 = arith.mulf %2, %24 : vector<1x16xf32>
      %28 = arith.addf %26, %27 : vector<1x16xf32>
      %29 = vector.extract_strided_slice %20 {offsets = [2, 0], sizes = [1, 16], strides = [1, 1]} : vector<8x16xf32> to vector<1x16xf32>
      %30 = arith.mulf %0, %29 : vector<1x16xf32>
      %31 = arith.mulf %2, %28 : vector<1x16xf32>
      %32 = arith.addf %30, %31 : vector<1x16xf32>
      %33 = vector.extract_strided_slice %20 {offsets = [3, 0], sizes = [1, 16], strides = [1, 1]} : vector<8x16xf32> to vector<1x16xf32>
      %34 = arith.mulf %0, %33 : vector<1x16xf32>
      %35 = arith.mulf %2, %32 : vector<1x16xf32>
      %36 = arith.addf %34, %35 : vector<1x16xf32>
      %37 = vector.extract_strided_slice %20 {offsets = [4, 0], sizes = [1, 16], strides = [1, 1]} : vector<8x16xf32> to vector<1x16xf32>
      %38 = arith.mulf %0, %37 : vector<1x16xf32>
      %39 = arith.mulf %2, %36 : vector<1x16xf32>
      %40 = arith.addf %38, %39 : vector<1x16xf32>
      %41 = vector.extract_strided_slice %20 {offsets = [5, 0], sizes = [1, 16], strides = [1, 1]} : vector<8x16xf32> to vector<1x16xf32>
      %42 = arith.mulf %0, %41 : vector<1x16xf32>
      %43 = arith.mulf %2, %40 : vector<1x16xf32>
      %44 = arith.addf %42, %43 : vector<1x16xf32>
      %45 = vector.extract_strided_slice %20 {offsets = [6, 0], sizes = [1, 16], strides = [1, 1]} : vector<8x16xf32> to vector<1x16xf32>
      %46 = arith.mulf %0, %45 : vector<1x16xf32>
      %47 = arith.mulf %2, %44 : vector<1x16xf32>
      %48 = arith.addf %46, %47 : vector<1x16xf32>
      %49 = vector.extract_strided_slice %20 {offsets = [7, 0], sizes = [1, 16], strides = [1, 1]} : vector<8x16xf32> to vector<1x16xf32>
      %50 = arith.mulf %0, %49 : vector<1x16xf32>
      %51 = arith.mulf %2, %48 : vector<1x16xf32>
      %52 = arith.addf %50, %51 : vector<1x16xf32>
      %53 = tpu.concatenate %24, %28, %32, %36, %40, %44, %48, %52 in 0 : vector<1x16xf32>, vector<1x16xf32>, vector<1x16xf32>, vector<1x16xf32>, vector<1x16xf32>, vector<1x16xf32>, vector<1x16xf32>, vector<1x16xf32> -> vector<8x16xf32>
      %c0_16 = arith.constant 0 : index
      %54 = arith.index_cast %18 : i32 to index
      %c0_17 = arith.constant 0 : index
      %55 = vector.load %arg4[%c0_16, %54, %c0_17] : memref<1x32x16xf32, #tpu.memory_space<vmem>>, vector<1x8x16xf32>
      %56 = vector.shape_cast %55 : vector<1x8x16xf32> to vector<8x16xf32>
      %57 = vector.shape_cast %53 : vector<8x16xf32> to vector<1x8x16xf32>
      tpu.vector_store %arg4[%c0_16, %54, %c0_17], %57 {strides = array<i32>} : memref<1x32x16xf32, #tpu.memory_space<vmem>>, vector<1x8x16xf32>,
      scf.yield %52 : vector<1x16xf32>
    }
    %c4_i32_10 = arith.constant 4 : i32
    %c0_11 = arith.constant 0 : index
    %c0_12 = arith.constant 0 : index
    %13 = vector.load %arg6[%c0_11, %c0_12] : memref<1x16xf32, #tpu.memory_space<vmem>>, vector<1x16xf32>
    tpu.vector_store %arg6[%c0_11, %c0_12], %12 {strides = array<i32>} : memref<1x16xf32, #tpu.memory_space<vmem>>, vector<1x16xf32>,
    %c0_i32_13 = arith.constant 0 : i32
    %14 = arith.cmpi eq, %arg1, %c0_i32_13 : i32
    %15 = arith.extui %14 : i1 to i32
    %c0_i32_14 = arith.constant 0 : i32
    %16 = arith.cmpi ne, %15, %c0_i32_14 : i32
    scf.if %16 {
      %c0_15 = arith.constant 0 : index
      %c0_16 = arith.constant 0 : index
      %17 = vector.load %arg5[%c0_15, %c0_16] : memref<32x16xf32, #tpu.memory_space<vmem>>, vector<1x16xf32>
      %c0_17 = arith.constant 0 : index
      %c0_18 = arith.constant 0 : index
      %c0_19 = arith.constant 0 : index
      %18 = vector.load %arg4[%c0_17, %c0_18, %c0_19] : memref<1x32x16xf32, #tpu.memory_space<vmem>>, vector<1x1x16xf32>
      %19 = vector.shape_cast %18 : vector<1x1x16xf32> to vector<1x16xf32>
      %20 = vector.shape_cast %17 : vector<1x16xf32> to vector<1x1x16xf32>
      tpu.vector_store %arg4[%c0_17, %c0_18, %c0_19], %20 {strides = array<i32>} : memref<1x32x16xf32, #tpu.memory_space<vmem>>, vector<1x1x16xf32>,
    } else {
    }
    return
  }
  func.func @transform_0(%arg0: i32, %arg1: i32) -> (i32, i32, i32) {
    %c0_i32 = arith.constant 0 : i32
    %c0_i32_0 = arith.constant 0 : i32
    return %arg0, %c0_i32, %arg1 : i32, i32, i32
  }
  func.func @transform_1(%arg0: i32, %arg1: i32) -> (i32, i32) {
    %c0_i32 = arith.constant 0 : i32
    %c0_i32_0 = arith.constant 0 : i32
    %c0_i32_1 = arith.constant 0 : i32
    return %c0_i32, %c0_i32_0 : i32, i32
  }
  func.func @transform_2(%arg0: i32, %arg1: i32) -> (i32, i32, i32) {
    %c0_i32 = arith.constant 0 : i32
    %c0_i32_0 = arith.constant 0 : i32
    return %arg0, %arg1, %c0_i32 : i32, i32, i32
  }
}

</mosaic_0001>

<bundles_post_ra>
// kernel: tpu_custom_call.1
= control target key start
LH: loop header
LB: loop body
LE: loop exit
PB: predicated region body
PF: predicated region fallthrough
CT: control target
= control target key end

     0   :  { %7 = vsyncpa [#allocation5], 0  ;;  %s888_s0 = inlined_call_operand.hbm [shape: f32[2,16,32], index: 0, kind: input, shape index: {}]   ;;  %s889_s1 = inlined_call_operand.vmem [shape: f32[1,16], index: 1, kind: input, shape index: {}]   ;;  %s890_s2 = inlined_call_operand.vmem [shape: f32[2,32,16], index: 2, kind: output, shape index: {}]  }
   0x1   :  { %9 = vsyncpa [#allocation5 + $0x1], 0  ;;  %s710_s9 = smov 0   ;;  %s712_s10 = smov 0  }
   0x2   :  { %s714_s11 = smov 0   ;;  %s716_s12 = smov 0  }
   0x3   :  { %s718_s13 = smov 0   ;;  %s720_s14 = smov 0  }
   0x4 LB: > { %s501_s15 = sadd.s32 4294967295, %s681_s14   ;;  %s27_s16 = sadd.s32 1, %s677_s13  ;;  %s681_s14 = sphi %s720_s14, %s15_s14   ;;  %s677_s13 = sphi %s718_s13, %s899_s13   ;;  %s673_s12 = sphi %s716_s12, %s898_s12   ;;  %s669_s11 = sphi %s714_s11, %s897_s11   ;;  %s665_s10 = sphi %s712_s10, %s896_s10   ;;  %s661_s9 = sphi %s710_s9, %s895_s9  }
   0x5   : > { %p29_p0 = scmp.ge.s32.totalorder %s27_s16, 2  ;;  %s36_s17 = sadd.s32 1, %s669_s11 }
   0x6   : > { %p43_p1 = scmp.ne.s32.totalorder %s669_s11, %s665_s10  ;;  %p44_p2 = scmp.eq.s32.totalorder %s681_s14, 0 }
   0x7   : > { %s901_s16 = smov (%p29_p0, %s27_s16), 0  ;;  %p49_p4 = scmp.ne.s32.totalorder %s665_s10, %s661_s9 }
   0x8   : > { %p746_p3 = por %p44_p2, %p43_p1  ;;  %s31_s19 = ssub.s32 %s677_s13, %s901_s16 }
   0x9   : > { %p50_p5 = scmp.eq.s32.totalorder %s501_s15, 0  ;;  %p34_p6 = scmp.eq.s32.totalorder %s31_s19, 0 }
   0xa   : > { %p523_p8 = scmp.lt.s32.totalorder %s681_s14, 2  ;;  %s125_s22 = sand.u32 1, %s669_s11  }
   0xb   : > { %p753_p7 = por %p50_p5, %p49_p4  ;;  %s515_s23 = sshll.u32 %s677_s13, 8 }
   0xc   : > { %s759_s21 = scalar_select %p34_p6, %s669_s11, %s36_s17  }
   0xd   : > { %s505_s24 = sshll.u32 %s125_s22, 4  ;;  %s766_s27 = scalar_lea.hbm %s888_s0, %s515_s23 }
   0xe   : > { %s129_s28 = scalar_lea.vmem [#allocation4], %s505_s24  ;;  %p770_p9 = pnand %p523_p8, %p746_p3 }
   0xf   : > { %s137_s29 = sshll.u32 %s129_s28, 4  ;;  %s776_s3 = scalar_lea.sflag [#allocation5], %s125_s22  ;;  %s774_s29 = int_to_ptr.vmem [resolvable:$true] %s137_s29 }
  0x10   : > { %s593_s4 = scalar_lea.hbm %s766_s27, 256  ;;  %p595_p11 = pneg %p770_p9 }
  0x11   : > { %p594_p10 = scmp.ne.s32.totalorder %s766_s27, %s593_s4  ;;  %s598_s7 = scalar_lea.hbm %s888_s0, 512 }
  0x12   : > { %p599_p0 = scmp.lt.u32.totalorder %s766_s27, %s888_s0  ;;  %p600_p1 = scmp.lt.u32.totalorder %s598_s7, %s593_s4 }
  0x13   : > { %p596_p12 = pnand %p595_p11, %p594_p10  ;;  %p602_p3 = scmp.lt.u32.totalorder %s593_s4, %s766_s27 }
  0x14   : > { %p601_p2 = por %p600_p1, %p599_p0 }
  0x15   : > { %p597_p13 = pneg %p596_p12 }
  0x16   : > { %p603_p4 = por %p602_p3, %p601_p2 }
  0x18   : > { %p604_p5 = pnand %p603_p4, %p597_p13 }
  0x1a   : > { %607 = shalt.err (!%p604_p5)
}
  0x1b   : > { %s608_s15 = scalar_lea.vmem %s774_s29, 256  ;;  %s691_s17 = smov [#allocation4]  }
  0x1c   : > { %p609_p6 = scmp.ne.s32.totalorder %s774_s29, %s608_s15  ;;  %s613_s18 = sshll.u32 %s691_s17, 4  ;;  %s614_s18 = int_to_ptr.vmem [resolvable:$false] %s613_s18 }
  0x1d   : > { %s615_s19 = scalar_lea.vmem %s614_s18, 512  ;;  %p616_p12 = scmp.lt.s32.totalorder %s774_s29, %s614_s18 }
  0x1e   : > { %p611_p8 = pnand %p609_p6, %p595_p11  ;;  %p617_p0 = scmp.lt.s32.totalorder %s615_s19, %s608_s15 }
  0x20   : > { %p612_p10 = pneg %p611_p8  ;;  %p618_p1 = por %p617_p0, %p616_p12 }
  0x22   : > { %p619_p2 = pnand %p618_p1, %p612_p10 }
  0x24   : > { %622 = shalt.err (!%p619_p2)
}
  0x25   : > { %s692_s22 = smov 128   ;;  %s693_s23 = smov 8  }
  0x26   : > { %522 = dma.hbm_to_vmem [thread:$0]  (!%p770_p9), %s766_s27, 256, %s774_s29, %s776_s3, %s692_s22, %s692_s22, %s693_s23  }
  0x27   : > { %p508_p11 = scmp.ge.s32.totalorder %s681_s14, 1  ;;  %p145_p13 = scmp.lt.s32.totalorder %s681_s14, 3 }
  0x29   : > { %p146_p3 = pnand %p508_p11, %p145_p13 }
  0x2a   : > { %s151_s24 = sand.u32 (!%p146_p3), 1, %s665_s10  }
  0x2b   : > { %149 = sbr.rel (%p146_p3) target bundleno = 243 (0xf3), region = 28  ;;  %s509_s25 = sshll.u32 (!%p146_p3), %s151_s24, 4 }
  0x2c   : > { %s152_s26 = scalar_lea.sflag (!%p146_p3), [#allocation5], %s151_s24  ;;  %s155_s28 = scalar_lea.vmem (!%p146_p3), [#allocation4], %s509_s25 }
  0x32   : > { %656 = dma.done.wait (%p753_p7), %s152_s26, 256  }
  0x33   : > { %658 = vsyncadd (%p753_p7), %s152_s26, 4294967040  ;;  %v814_v0 = vld [vmem:[%s889_s1] sm:$0x1]  ;;  %v192_v1 = vld [vmem:[%s155_s28] sm:$0xff]  ;;  %p181_p9 = scmp.lt.s32.totalorder %s673_s12, 1  ;;  %vm226_vm0 = vcmask 130048  }
  0x34   : > { %v817_v2 = vsub.f32 1.0, %v814_v0  ;;  %194 = vxpose.xlu0.b32.start [1/2] (short) (narrow) %v192_v1, 32  ;;  %v193_v3 = vld [vmem:[%s155_s28 + $0x8] sm:$0xff]  ;;  %vm236_vm1 = vcmask 122880  }
  0x35   : > { %s903_s12 = smov (!%p181_p9, %s673_s12), 1 }
  0x36   : > { %s516_s27 = sshll.u32 %s903_s12, 5  ;;  %s833_s12 = smov 0  }
  0x37   : > { %s824_s30 = scalar_lea.vmem %s890_s2, %s516_s27 }
  0x38   : > { %195 = vxpose.xlu0.b32.end [2/2] (short) (narrow) %v193_v3, 32 }
  0xb4   : > { %v210_v4 = vpop.trf.xlu0 }
  0xb5   : > { %227 = vst.msk [vmem:[#allocation2] sm:$0xff] %vm226_vm0, %v210_v4 }
  0xb8   : > { %v211_v5 = vpop.trf.xlu0 }
  0xb9   : > { %228 = vst.msk [vmem:[#allocation2 + $0x8] sm:$0xff] %vm226_vm0, %v211_v5 }
  0xbc   : > { %v235_v6 = vld [vmem:[#allocation2] sm:$0x1]  ;;  %v212_v7 = vpop.trf.xlu0 }
  0xbd   : > { %237 = vst.msk [vmem:[#allocation3] sm:$0x1] %vm236_vm1, %v235_v6 }
  0xbe   : > { %229 = vst.msk [vmem:[#allocation2 + $0x10] sm:$0xff] %vm226_vm0, %v212_v7 }
  0xc0   : > { %v213_v8 = vpop.trf.xlu0 }
  0xc1   : > { %230 = vst.msk [vmem:[#allocation2 + $0x18] sm:$0xff] %vm226_vm0, %v213_v8 }
  0xc4   : > { %v238_v9 = vld [vmem:[#allocation3] sm:$0x1]  }
  0xc5 LB: >> { %v256_v10 = vlaneseq  ;;  %v694_v11 = vmov 1966171168   ;;  %s512_s3 = sshll.u32 %s689_s12, 3  ;;  %v250_v14 = vmul.f32 %v685_v9, %v817_v2  ;;  %vm372_vm2 = vcmask 1040384   ;;  %s244_s12 = sadd.s32 1, %s689_s12   ;;  %s689_s12 = sphi %s833_s12, %s244_s12   ;;  %v685_v9 = vphi %v238_v9, %v894_v9  }
  0xc6   : >> { %v254_v12 = vunpack.c.l.s4 %v694_v11  ;;  %s247_s6 = scalar_lea.vmem [#allocation2], %s512_s3  ;;  %vm374_vm3 = vcmask 1041408   ;;  %vm376_vm4 = vcmask 1042432   ;;  %vm378_vm5 = vcmask 1043456   ;;  %s386_s7 = scalar_lea.vmem %s824_s30, %s512_s3 }
  0xc7   : >> { %v257_v13 = vshrl.u32 %v256_v10, 7  ;;  %vm380_vm6 = vcmask 1044480   ;;  %vm382_vm7 = vcmask 1045504   ;;  %vm384_vm8 = vcmask 1046528   ;;  %p241_p7 = scmp.ge.s32.totalorder %s244_s12, 4  }
  0xc8   : >> { %v255_v15 = vunpack.c.0.s8 %v254_v12  ;;  %v248_v16 = vld [vmem:[%s247_s6] sm:$0xff] }
  0xc9   : >> { %v249_v17 = vmul.f32 %v248_v16, %v814_v0  ;;  %v289_v26 = vcombine.high %v248_v16, %v248_v16  ;;  %v333_v33 = vsub.s32 0, %v257_v13  ;;  %v393_v7 = vld [vmem:[#allocation2] sm:$0x1] (%p241_p7) }
  0xca   : >> { %v258_v18 = vsub.s32 %v255_v15, %v257_v13 }
  0xcb   : >> { %v251_v19 = vadd.f32 %v250_v14, %v249_v17 }
  0xcc   : >> { %v259_v20 = vrot.slane %v248_v16, %v258_v18  ;;  %v296_v31 = vrot.slane %v289_v26, %v258_v18 }
  0xcd   : >> { %v277_v24 = vmul.f32 %v251_v19, %v817_v2 }
  0xce   : >> { %v260_v21 = vcombine.high %v259_v20, %v259_v20  ;;  %v267_v22 = vrot.slane %v259_v20, %v258_v18  ;;  %v303_v36 = vrot.slane %v296_v31, %v258_v18  ;;  %v308_v37 = vcombine.high %v296_v31, %v296_v31 }
  0xd0   : >> { %v274_v23 = vrot.slane %v260_v21, %v258_v18  ;;  %v279_v25 = vcombine.high %v267_v22, %v267_v22  ;;  %v305_v41 = vmul.f32 %v303_v36, %v814_v0  ;;  %v315_v42 = vrot.slane %v308_v37, %v258_v18 }
  0xd1   : >> { %v320_v48 = vcombine.high %v303_v36, %v303_v36 }
  0xd2   : >> { %v276_v27 = vmul.f32 %v274_v23, %v814_v0  ;;  %v281_v29 = vmul.f32 %v279_v25, %v814_v0  ;;  %v284_v30 = vcombine.high %v274_v23, %v274_v23  ;;  %v317_v47 = vmul.f32 %v315_v42, %v814_v0 }
  0xd3   : >> { %v322_v54 = vmul.f32 %v320_v48, %v814_v0  ;;  %v325_v55 = vcombine.high %v315_v42, %v315_v42 }
  0xd4   : >> { %v278_v28 = vadd.f32 %v277_v24, %v276_v27  ;;  %v286_v35 = vmul.f32 %v284_v30, %v814_v0 }
  0xd5   : >> { %v327_v61 = vmul.f32 %v325_v55, %v814_v0 }
  0xd6   : >> { %v282_v32 = vmul.f32 %v278_v28, %v817_v2  ;;  %v334_v39 = vrot.slane %v278_v28, %v333_v33 }
  0xd8   : >> { %v283_v34 = vadd.f32 %v282_v32, %v281_v29  ;;  %v373_v45 = vsel %vm372_vm2, %v251_v19, %v334_v39 }
  0xda   : >> { %v287_v38 = vmul.f32 %v283_v34, %v817_v2  ;;  %v340_v43 = vrot.slane %v283_v34, %v333_v33 }
  0xdc   : >> { %v288_v40 = vadd.f32 %v287_v38, %v286_v35  ;;  %v375_v50 = vsel %vm374_vm3, %v373_v45, %v340_v43 }
  0xde   : >> { %v306_v44 = vmul.f32 %v288_v40, %v817_v2  ;;  %v346_v49 = vrot.slane %v288_v40, %v333_v33 }
  0xe0   : >> { %v307_v46 = vadd.f32 %v306_v44, %v305_v41  ;;  %v377_v56 = vsel %vm376_vm4, %v375_v50, %v346_v49 }
  0xe2   : >> { %v318_v51 = vmul.f32 %v307_v46, %v817_v2  ;;  %v352_v52 = vrot.slane %v307_v46, %v333_v33 }
  0xe4   : >> { %v319_v53 = vadd.f32 %v318_v51, %v317_v47  ;;  %v379_v59 = vsel %vm378_vm5, %v377_v56, %v352_v52 }
  0xe6   : >> { %v323_v57 = vmul.f32 %v319_v53, %v817_v2  ;;  %v358_v58 = vrot.slane %v319_v53, %v333_v33 }
  0xe8   : >> { %v324_v60 = vadd.f32 %v323_v57, %v322_v54  ;;  %v381_v1 = vsel %vm380_vm6, %v379_v59, %v358_v58 }
  0xea   : >> { %v328_v62 = vmul.f32 %v324_v60, %v817_v2  ;;  %v364_v63 = vrot.slane %v324_v60, %v333_v33 }
  0xeb   : > { %243 = sbr.rel (!%p241_p7) target bundleno = 197 (0xc5), region = 85 }
  0xec   : >> { %v329_v3 = vadd.f32 %v328_v62, %v327_v61   ;;  %v383_v4 = vsel %vm382_vm7, %v381_v1, %v364_v63 }
  0xee   : >> { %v370_v5 = vrot.slane %v329_v3, %v333_v33  ;;  %v894_v9 = vmov %v329_v3  ;;  %389 = vst.msk [vmem:[#allocation3] sm:$0x1] (%p241_p7), %vm236_vm1, %v329_v3 }
  0xf0   : >> { %v385_v6 = vsel %vm384_vm8, %v383_v4, %v370_v5 }
  0xf1   : >> { %387 = vst.msk [vmem:[%s386_s7] sm:$0xff] %vm226_vm0, %v385_v6 }
  0xf2   : > { %394 = vst.msk [vmem:[%s824_s30] sm:$0x1] %vm236_vm1, %v393_v7 }
  0xf3 PF: > { %s15_s14 = sadd.s32 1, %s681_s14   ;;  %s895_s9 = smov %s665_s10 }
  0xf4   : > { %p12_p4 = scmp.ge.s32.totalorder %s15_s14, 4   ;;  %s896_s10 = smov %s669_s11 }
  0xf5   : > { %s897_s11 = smov %s759_s21  ;;  %s898_s12 = smov %s677_s13 }
  0xf6   : > { %s899_s13 = smov %s901_s16  ;;  %14 = sbr.rel (!%p12_p4) target bundleno = 4 (0x4), region = 96 }
  0xfd   :  { %425 = vsyncpa [#allocation5], 1 }
  0xfe   :  { %427 = vsyncpa [#allocation5 + $0x1], 1 }

</bundles_post_ra>
